<compile_context>
chip_gen: v5e
topology: v5e:2x2
jax: 0.10.0
libtpu: 0.0.40
codegen_flags: <defaults>
</compile_context>

<pallas_src>
import jax
import jax.numpy as jnp
from jax.experimental import pallas as pl
from jax.experimental.pallas import tpu as pltpu

BN_EPS = 1e-5
NORM_EPS = 1e-12


# --------------------------------------------------------------------------- #
# Kernel: K-tiled matmul accumulation + fused bias / L2-normalize epilogue.
# --------------------------------------------------------------------------- #
def arcface_head_kernel(x_ref, w_ref, b_ref, o_ref, acc_ref):
    k = pl.program_id(1)

    @pl.when(k == 0)
    def _():
        acc_ref[...] = jnp.zeros_like(acc_ref)

    # bf16 x bf16 -> f32 accumulate on the MXU.
    acc_ref[...] += jnp.dot(x_ref[...], w_ref[...],
                            preferred_element_type=jnp.float32)

    @pl.when(k == pl.num_programs(1) - 1)
    def _():
        y = acc_ref[...] + b_ref[...]                       # folded BN + bias
        sumsq = jnp.sum(y * y, axis=-1, keepdims=True)
        inv = jax.lax.rsqrt(jnp.maximum(sumsq, NORM_EPS * NORM_EPS))
        o_ref[...] = (y * inv).astype(o_ref.dtype)


# --------------------------------------------------------------------------- #
# Parameter folding (wrapper-side, once per weight set).
# --------------------------------------------------------------------------- #
def fold_params(params):
    """Fold BN1 / BN2 affines into the Linear weight/bias. Returns bf16 W', f32 b'."""
    s1 = params["bn1_g"] * jax.lax.rsqrt(params["bn1_v"] + BN_EPS)   # (1, F)
    t1 = params["bn1_b"] - params["bn1_m"] * s1                      # (1, F)
    s2 = params["bn2_g"] * jax.lax.rsqrt(params["bn2_v"] + BN_EPS)   # (1, E)
    t2 = params["bn2_b"] - params["bn2_m"] * s2                      # (1, E)
    w = params["fc_w_t"]                                             # (F, E)
    w_folded = (s1.reshape(-1, 1) * w) * s2.reshape(1, -1)
    b_folded = (t1 @ w) * s2 + params["fc_b"] * s2 + t2              # (1, E)
    return w_folded.astype(jnp.bfloat16), b_folded.astype(jnp.float32)


# --------------------------------------------------------------------------- #
# Wrapper
# --------------------------------------------------------------------------- #
def arcface_embedding_head(x, params, *, tb=None, tk=None):
    """x: (B, in_features). params: raw module params (see init_params)."""
    B, F = x.shape
    E = params["fc_w_t"].shape[1]
    assert E % 128 == 0, "embedding_size must be a multiple of 128 (lane-dense stores)"

    # Batch tile: multiple of 8 (f32/bf16 sublane), capped so the grid pipelines.
    if tb is None:
        tb = B
        for cand in (256, 128, 64, 32, 16, 8):
            if B % cand == 0:
                tb = cand
                break
    assert B % tb == 0 and (tb % 8 == 0 or tb == B), \
        "tb must divide B and be a multiple of 8 (or equal B)"

    # K tile: stream the weight through the pipeline in 128-aligned chunks.
    if tk is None:
        tk = F
        for cand in (2048, 1024, 512, 256, 128):
            if F % cand == 0:
                tk = cand
                break
    assert F % tk == 0, "in_features must be divisible by tk"

    w_folded, b_folded = fold_params(params)
    x_lp = x.astype(jnp.bfloat16)          # halve activation HBM traffic

    # Size scoped VMEM to the actual tile footprint (with headroom).
    tile_bytes = (2 * (tb * tk + tk * E) * 2   # double-buffered bf16 x / w tiles
                  + 2 * E * 4                  # bias (double-buffered)
                  + tb * E * 4                 # f32 accumulator scratch
                  + 2 * tb * E * 4)            # double-buffered f32 output tile
    vmem_limit = int(min(max(4 * tile_bytes, 32 << 20), 100 << 20))

    return pl.pallas_call(
        arcface_head_kernel,
        out_shape=jax.ShapeDtypeStruct((B, E), x.dtype),
        grid_spec=pltpu.PrefetchScalarGridSpec(
            num_scalar_prefetch=0,
            grid=(B // tb, F // tk),
            in_specs=[
                pl.BlockSpec((tb, tk), lambda i, k: (i, k)),   # x tile (bf16)
                pl.BlockSpec((tk, E), lambda i, k: (k, 0)),    # folded W tile (bf16)
                pl.BlockSpec((1, E), lambda i, k: (0, 0)),     # folded bias (f32)
            ],
            out_specs=pl.BlockSpec((tb, E), lambda i, k: (i, 0)),
            scratch_shapes=[pltpu.VMEM((tb, E), jnp.float32)],
        ),
        compiler_params=pltpu.CompilerParams(
            dimension_semantics=("parallel", "arbitrary"),
            vmem_limit_bytes=vmem_limit),
    )(x_lp, w_folded, b_folded)


# --------------------------------------------------------------------------- #
# Params + references
# --------------------------------------------------------------------------- #
def init_params(key, in_features, embedding_size):
    ks = jax.random.split(key, 8)
    f32 = jnp.float32
    return {
        # BatchNorm1d(in_features)
        "bn1_g": jax.random.uniform(ks[0], (1, in_features), f32, 0.5, 1.5),
        "bn1_b": jax.random.normal(ks[1], (1, in_features), f32) * 0.1,
        "bn1_m": jax.random.normal(ks[2], (1, in_features), f32) * 0.1,
        "bn1_v": jax.random.uniform(ks[3], (1, in_features), f32, 0.5, 1.5),
        # Linear(in_features, embedding_size): stored as W^T = (in_features, emb)
        "fc_w_t": jax.random.normal(ks[4], (in_features, embedding_size), f32)
                  * (1.0 / jnp.sqrt(in_features)),
        "fc_b": jax.random.normal(ks[5], (1, embedding_size), f32) * 0.01,
        # BatchNorm1d(embedding_size): weight frozen at 1.0 per module __init__
        "bn2_g": jnp.ones((1, embedding_size), f32),
        "bn2_b": jax.random.normal(ks[6], (1, embedding_size), f32) * 0.1,
        "bn2_m": jax.random.normal(ks[7], (1, embedding_size), f32) * 0.1,
        "bn2_v": jnp.ones((1, embedding_size), f32),
    }


def reference_f32(x, p):
    """Pure-JAX f32 reference with original (unfolded) eval-mode semantics."""
    xn = (x - p["bn1_m"]) / jnp.sqrt(p["bn1_v"] + BN_EPS) * p["bn1_g"] + p["bn1_b"]
    y = xn @ p["fc_w_t"] + p["fc_b"]
    y = (y - p["bn2_m"]) / jnp.sqrt(p["bn2_v"] + BN_EPS) * p["bn2_g"] + p["bn2_b"]
    n = jnp.sqrt(jnp.sum(y * y, axis=-1, keepdims=True))
    return y / jnp.maximum(n, NORM_EPS)


def reference_folded(x, w_folded, b_folded):
    """Matched-precision reference: same folded bf16 weights the kernel consumes."""
    y = jnp.dot(x.astype(jnp.bfloat16), w_folded,
                preferred_element_type=jnp.float32) + b_folded
    sumsq = jnp.sum(y * y, axis=-1, keepdims=True)
    return y * jax.lax.rsqrt(jnp.maximum(sumsq, NORM_EPS * NORM_EPS))


if __name__ == "__main__":
    B, IN_FEATURES, EMBEDDING_SIZE = 8, 256, 128

    key = jax.random.PRNGKey(0)
    kx, kp = jax.random.split(key)
    x = jax.random.normal(kx, (B, IN_FEATURES), jnp.float32)
    params = init_params(kp, IN_FEATURES, EMBEDDING_SIZE)

    # tk=128 -> 2 K-steps, exercising the accumulator path even at small F.
    out = arcface_embedding_head(x, params, tk=128)
    out = jax.block_until_ready(out)
    assert out.shape == (B, EMBEDDING_SIZE)

    # Exact-mechanism check (same bf16 folded weights, f32 accumulation).
    w_f, b_f = fold_params(params)
    ref_match = reference_folded(x, w_f, b_f)
    assert jnp.allclose(out, ref_match, atol=1e-4, rtol=1e-4), \
        "mismatch vs matched-precision folded reference"

    # End-to-end check vs the original f32 semantics (bf16 rounding tolerance).
    ref = reference_f32(x, params)
    assert jnp.allclose(out, ref, atol=1e-2, rtol=1e-2), \
        "mismatch vs f32 eval-mode reference"

    print("KERNEL_OK")
</pallas_src>

<mosaic_0001>
module attributes {stable_mosaic.version = 11 : i64} {
  func.func @arcface_head_kernel(%arg0: i32, %arg1: i32, %arg2: memref<8x128xbf16, #tpu.memory_space<vmem>>, %arg3: memref<128x128xbf16, #tpu.memory_space<vmem>>, %arg4: memref<1x128xf32, #tpu.memory_space<vmem>>, %arg5: memref<8x128xf32, #tpu.memory_space<vmem>>, %arg6: memref<8x128xf32, #tpu.memory_space<vmem>>) attributes {dimension_semantics = [#tpu.dimension_semantics<parallel>, #tpu.dimension_semantics<arbitrary>], iteration_bounds = array<i64: 1, 2>, scalar_prefetch = 0 : i64, scratch_operands = 1 : i64, tpu.core_type = #tpu.core_type<tc>, window_params = [{transform_indices = @transform_0, window_bounds = array<i64: 8, 128>}, {transform_indices = @transform_1, window_bounds = array<i64: 128, 128>}, {pipeline_mode = #tpu.pipeline_mode<synchronous>, transform_indices = @transform_2, window_bounds = array<i64: 1, 128>}, {transform_indices = @transform_3, window_bounds = array<i64: 8, 128>}]} {
    %c0_i32 = arith.constant 0 : i32
    %0 = arith.cmpi eq, %arg1, %c0_i32 : i32
    %1 = arith.extui %0 : i1 to i32
    %c0_i32_0 = arith.constant 0 : i32
    %2 = arith.cmpi ne, %1, %c0_i32_0 : i32
    scf.if %2 {
      %cst_9 = arith.constant 0.000000e+00 : f32
      %12 = vector.broadcast %cst_9 : f32 to vector<8x128xf32>
      %c0_10 = arith.constant 0 : index
      %c0_11 = arith.constant 0 : index
      %13 = vector.load %arg6[%c0_10, %c0_11] : memref<8x128xf32, #tpu.memory_space<vmem>>, vector<8x128xf32>
      tpu.vector_store %arg6[%c0_10, %c0_11], %12 {strides = array<i32>} : memref<8x128xf32, #tpu.memory_space<vmem>>, vector<8x128xf32>,
    } else {
    }
    %c0 = arith.constant 0 : index
    %c0_1 = arith.constant 0 : index
    %3 = vector.load %arg6[%c0, %c0_1] : memref<8x128xf32, #tpu.memory_space<vmem>>, vector<8x128xf32>
    %c0_2 = arith.constant 0 : index
    %c0_3 = arith.constant 0 : index
    %4 = vector.load %arg2[%c0_2, %c0_3] : memref<8x128xbf16, #tpu.memory_space<vmem>>, vector<8x128xbf16>
    %c0_4 = arith.constant 0 : index
    %c0_5 = arith.constant 0 : index
    %5 = vector.load %arg3[%c0_4, %c0_5] : memref<128x128xbf16, #tpu.memory_space<vmem>>, vector<128x128xbf16>
    %cst = arith.constant dense<0.000000e+00> : vector<8x128xf32>
    %6 = tpu.matmul %4, %5, %cst {dimension_numbers = #tpu.dot_dimension_numbers<[1], [0], [0], [1], [0, 0, 1, 1], [], []>} : vector<8x128xbf16>, vector<128x128xbf16>, vector<8x128xf32> -> vector<8x128xf32>
    %7 = arith.addf %3, %6 : vector<8x128xf32>
    %c0_6 = arith.constant 0 : index
    %c0_7 = arith.constant 0 : index
    %8 = vector.load %arg6[%c0_6, %c0_7] : memref<8x128xf32, #tpu.memory_space<vmem>>, vector<8x128xf32>
    tpu.vector_store %arg6[%c0_6, %c0_7], %7 {strides = array<i32>} : memref<8x128xf32, #tpu.memory_space<vmem>>, vector<8x128xf32>,
    %c1_i32 = arith.constant 1 : i32
    %9 = arith.cmpi eq, %arg1, %c1_i32 : i32
    %10 = arith.extui %9 : i1 to i32
    %c0_i32_8 = arith.constant 0 : i32
    %11 = arith.cmpi ne, %10, %c0_i32_8 : i32
    scf.if %11 {
      %c0_9 = arith.constant 0 : index
      %c0_10 = arith.constant 0 : index
      %12 = vector.load %arg6[%c0_9, %c0_10] : memref<8x128xf32, #tpu.memory_space<vmem>>, vector<8x128xf32>
      %c0_11 = arith.constant 0 : index
      %c0_12 = arith.constant 0 : index
      %13 = vector.load %arg4[%c0_11, %c0_12] : memref<1x128xf32, #tpu.memory_space<vmem>>, vector<1x128xf32>
      %14 = vector.broadcast %13 : vector<1x128xf32> to vector<8x128xf32>
      %15 = arith.addf %12, %14 : vector<8x128xf32>
      %16 = arith.mulf %15, %15 : vector<8x128xf32>
      %cst_13 = arith.constant dense<0.000000e+00> : vector<8xf32>
      %17 = vector.multi_reduction <add>, %16, %cst_13 [1] : vector<8x128xf32> to vector<8xf32>
      %18 = vector.shape_cast %17 : vector<8xf32> to vector<8x1xf32>
      %cst_14 = arith.constant 1.000000e-24 : f32
      %19 = vector.broadcast %cst_14 : f32 to vector<8x1xf32>
      %20 = arith.maximumf %18, %19 : vector<8x1xf32>
      %21 = math.rsqrt %20 : vector<8x1xf32>
      %22 = vector.broadcast %21 : vector<8x1xf32> to vector<8x128xf32>
      %23 = arith.mulf %15, %22 : vector<8x128xf32>
      %c0_15 = arith.constant 0 : index
      %c0_16 = arith.constant 0 : index
      %24 = vector.load %arg5[%c0_15, %c0_16] : memref<8x128xf32, #tpu.memory_space<vmem>>, vector<8x128xf32>
      tpu.vector_store %arg5[%c0_15, %c0_16], %23 {strides = array<i32>} : memref<8x128xf32, #tpu.memory_space<vmem>>, vector<8x128xf32>,
    } else {
    }
    return
  }
  func.func @transform_0(%arg0: i32, %arg1: i32) -> (i32, i32) {
    %c0_i32 = arith.constant 0 : i32
    return %arg0, %arg1 : i32, i32
  }
  func.func @transform_1(%arg0: i32, %arg1: i32) -> (i32, i32) {
    %c0_i32 = arith.constant 0 : i32
    %c0_i32_0 = arith.constant 0 : i32
    return %arg1, %c0_i32 : i32, i32
  }
  func.func @transform_2(%arg0: i32, %arg1: i32) -> (i32, i32) {
    %c0_i32 = arith.constant 0 : i32
    %c0_i32_0 = arith.constant 0 : i32
    %c0_i32_1 = arith.constant 0 : i32
    return %c0_i32, %c0_i32_0 : i32, i32
  }
  func.func @transform_3(%arg0: i32, %arg1: i32) -> (i32, i32) {
    %c0_i32 = arith.constant 0 : i32
    %c0_i32_0 = arith.constant 0 : i32
    return %arg0, %c0_i32 : i32, i32
  }
}

</mosaic_0001>

<bundles_post_ra>
// kernel: tpu_custom_call.1
= control target key start
LH: loop header
LB: loop body
LE: loop exit
PB: predicated region body
PF: predicated region fallthrough
CT: control target
= control target key end

     0   :  { %8 = vsyncpa [#allocation4], 0  ;;  %s869_s0 = inlined_call_operand.hbm [shape: bf16[8,256], index: 0, kind: input, shape index: {}]   ;;  %s870_s1 = inlined_call_operand.hbm [shape: bf16[256,128], index: 1, kind: input, shape index: {}]   ;;  %s871_s2 = inlined_call_operand.vmem [shape: f32[1,128], index: 2, kind: input, shape index: {}]   ;;  %s872_s3 = inlined_call_operand.hbm [shape: f32[8,128], index: 3, kind: output, shape index: {}]  }
   0x1   :  { %10 = vsyncpa [#allocation4 + $0x1], 0 }
   0x2   :  { %11 = vsyncpa [#allocation7], 0 }
   0x3   :  { %13 = vsyncpa [#allocation7 + $0x1], 0 }
   0x4   :  { %14 = vsyncpa [#allocation5], 0  ;;  %s752_s12 = smov 0   ;;  %s754_s13 = smov 0  }
   0x5   :  { %s756_s14 = smov 0   ;;  %s758_s15 = smov 0  }
   0x6   :  { %s760_s16 = smov 0   ;;  %s762_s17 = smov 0  }
   0x7 LB: > { %s449_s18 = sadd.s32 4294967295, %s726_s17   ;;  %s29_s19 = sadd.s32 1, %s722_s16  ;;  %s726_s17 = sphi %s762_s17, %s20_s17   ;;  %s722_s16 = sphi %s760_s16, %s880_s16   ;;  %s718_s15 = sphi %s758_s15, %s879_s15   ;;  %s714_s14 = sphi %s756_s14, %s878_s14   ;;  %s710_s13 = sphi %s754_s13, %s877_s13   ;;  %s706_s12 = sphi %s752_s12, %s876_s12  }
   0x8   : > { %p30_p0 = scmp.ge.s32.totalorder %s29_s19, 2  ;;  %s41_s20 = sadd.s32 1, %s714_s14 }
   0x9   : > { %p48_p1 = scmp.ne.s32.totalorder %s714_s14, %s710_s13  ;;  %p49_p2 = scmp.eq.s32.totalorder %s726_s17, 0 }
   0xa   : > { %s882_s19 = smov (%p30_p0, %s29_s19), 0  ;;  %p54_p4 = scmp.ne.s32.totalorder %s710_s13, %s706_s12 }
   0xb   : > { %p788_p3 = por %p49_p2, %p48_p1  ;;  %s37_s22 = ssub.s32 %s722_s16, %s882_s19 }
   0xc   : > { %p55_p5 = scmp.eq.s32.totalorder %s449_s18, 0  ;;  %p39_p6 = scmp.eq.s32.totalorder %s37_s22, 0 }
   0xd   : > { %p522_p8 = scmp.lt.s32.totalorder %s726_s17, 2  ;;  %s806_s25 = sand.u32 1, %s714_s14  }
   0xe   : > { %p797_p7 = por %p55_p5, %p54_p4  ;;  %s453_s26 = sshll.u32 %s722_s16, 2 }
   0xf   : > { %s803_s24 = scalar_select %p39_p6, %s714_s14, %s41_s20  }
  0x10   : > { %s452_s27 = sshll.u32 %s806_s25, 2  ;;  %s164_s30 = scalar_lea.hbm %s869_s0, %s453_s26 }
  0x11   : > { %s166_s4 = sshll.u32 %s164_s30, 4  ;;  %s158_s5 = scalar_lea.vmem [#allocation3], %s452_s27  ;;  %s167_s4 = int_to_ptr.hbm [resolvable:$true] %s166_s4 }
  0x12   : > { %s168_s6 = sshll.u32 %s158_s5, 4  ;;  %p815_p9 = pnand %p522_p8, %p788_p3  ;;  %s169_s6 = int_to_ptr.vmem [resolvable:$true] %s168_s6 }
  0x13   : > { %p457_p10 = scmp.ge.s32.totalorder %s726_s17, 1  ;;  %p195_p11 = scmp.lt.s32.totalorder %s726_s17, 3 }
  0x14   : > { %s454_s8 = sshll.u32 %s806_s25, 6  ;;  %s155_s9 = scalar_lea.sflag [#allocation4], %s806_s25 }
  0x15   : > { %518 = dma.hbm_to_vmem [thread:$0]  (!%p815_p9), %s167_s4, 64, %s169_s6, %s155_s9  }
  0x16   : > { %p196_p12 = pnand %p457_p10, %p195_p11  ;;  %s498_s10 = sshll.u32 %s722_s16, 6 }
  0x17   : > { %s179_s11 = scalar_lea.vmem [#allocation6], %s454_s8  ;;  %s184_s21 = scalar_lea.hbm %s870_s1, %s498_s10 }
  0x18   : > { %s187_s12 = sshll.u32 %s179_s11, 4  ;;  %s185_s26 = sshll.u32 %s184_s21, 4  ;;  %s188_s12 = int_to_ptr.vmem [resolvable:$true] %s187_s12  ;;  %s186_s26 = int_to_ptr.hbm [resolvable:$true] %s185_s26 }
  0x19   : > { %s176_s27 = scalar_lea.sflag [#allocation7], %s806_s25  ;;  %s728_s28 = smov 64  }
  0x1a   : > { %s729_s29 = smov 4   ;;  %199 = sbr.rel (%p196_p12) target bundleno = 361 (0x169), region = 32 }
  0x1b   : > { %521 = dma.hbm_to_vmem [thread:$0]  (!%p815_p9), %s186_s26, 1024, %s188_s12, %s176_s27, %s728_s28, %s728_s28, %s729_s29  }
  0x1c   : > { %s201_s30 = sand.u32 (!%p196_p12), 1, %s710_s13  }
  0x1d   : > { %s458_s4 = sshll.u32 (!%p196_p12), %s201_s30, 2  ;;  %s202_s5 = scalar_lea.sflag (!%p196_p12), [#allocation4], %s201_s30 }
  0x1e   : > { %s205_s6 = scalar_lea.vmem (!%p196_p12), [#allocation3], %s458_s4 }
  0x1f   : > { %693 = dma.done.wait (%p797_p7), %s202_s5, 64  }
  0x20   : > { %695 = vsyncadd (%p797_p7), %s202_s5, 4294967232  ;;  %s459_s8 = sshll.u32 %s201_s30, 6  ;;  %s212_s9 = scalar_lea.sflag [#allocation7], %s201_s30 }
  0x21   : > { %s215_s25 = scalar_lea.vmem [#allocation6], %s459_s8 }
  0x22   : > { %697 = dma.done.wait (%p797_p7), %s212_s9, 1024  }
  0x23   : > { %699 = vsyncadd (%p797_p7), %s212_s9, 4294966272  ;;  %p460_p13 = scmp.ne.s32.totalorder %s718_s15, 0 }
  0x25   : > { %243 = sbr.rel (%p460_p13) target bundleno = 44 (0x2c), region = 44 }
  0x2a   : > { %v730_v0 = vmov 0.0  }
  0x2b   : > { %244 = vst [vmem:[#allocation2] sm:$0xff] %v730_v0 }
  0x2c PF: > { %v506_v1 = vld [vmem:[%s215_s25 + $0x38] sm:$0xff]  ;;  %v505_v2 = vld [vmem:[%s215_s25 + $0x30] sm:$0xff]  ;;  %v504_v3 = vld [vmem:[%s215_s25 + $0x28] sm:$0xff]  ;;  %p493_p0 = scmp.ne.s32.totalorder %s718_s15, 1 }
  0x2d   : > { %311 = vmatpush.bf16.msra.mxu0 %v506_v1  ;;  %v503_v4 = vld [vmem:[%s215_s25 + $0x20] sm:$0xff]  ;;  %v502_v5 = vld [vmem:[%s215_s25 + $0x18] sm:$0xff]  ;;  %v501_v6 = vld [vmem:[%s215_s25 + $0x10] sm:$0xff] }
  0x2e   : > { %v500_v7 = vld [vmem:[%s215_s25 + $0x8] sm:$0xff]  ;;  %v499_v8 = vld [vmem:[%s215_s25] sm:$0xff]  ;;  %v246_v9 = vld [vmem:[%s205_s6] sm:$0xf] }
  0x31   : > { %312 = vmatpush.bf16.msra.mxu0 %v505_v2 }
  0x32   : > { %v245_v10 = vld [vmem:[#allocation2] sm:$0xff] }
  0x35   : > { %313 = vmatpush.bf16.msra.mxu0 %v504_v3 }
  0x39   : > { %314 = vmatpush.bf16.msra.mxu0 %v503_v4 }
  0x3d   : > { %315 = vmatpush.bf16.msra.mxu0 %v502_v5 }
  0x41   : > { %316 = vmatpush.bf16.msra.mxu0 %v501_v6 }
  0x45   : > { %317 = vmatpush.bf16.msra.mxu0 %v500_v7 }
  0x49   : > { %318 = vmatpush.bf16.msra.mxu0 %v499_v8 }
  0x4c   : > { %319 = vmatmul.bf16.vlgmr.msra.gmra.mxu0 %v246_v9 }
  0xc9   : > { %v320_v11 = vpop.f32.mrf.mxu0 }
  0xca   : > { %v324_v12 = vadd.f32 %v320_v11, %v245_v10 }
  0xcc   : > { %325 = vst [vmem:[#allocation2] sm:$0xff] %v324_v12 }
  0xcd   : > { %329 = sbr.rel (%p493_p0) target bundleno = 355 (0x163), region = 48 }
  0xd1   : > { %v322_v13 = vpop.f32.mrf.mxu0 }
  0xd2   : > { %v577_v15 = vld [vmem:[%s871_s2] ss:$0 sm:$0xff] }
  0xd3   : > { %v330_v14 = vld [vmem:[#allocation2] sm:$0xff] }
  0xd4   : > { %v335_v16 = vadd.f32 %v577_v15, %v330_v14 }
  0xd6   : > { %v336_v17 = vmul.f32 %v335_v16, %v335_v16 }
  0xd8   : > { %337 = vadd.xlane.f32.xlu0 %v336_v17 }
 0x14b   : > { %v338_v18 = vpop.xlane.xlu0 %337 }
 0x14c   : > { %v339_v19 = vmax.f32 %v338_v18, 1e-24 }
 0x14e   : > { %578 = vrsqrt.f32 %v339_v19  ;;  %vm346_vm1 = vweird.f32 %v339_v19 }
 0x154   : > { %v579_v20 = vpop.eup %578 }
 0x155   : > { %v341_v21 = vmul.f32 %v579_v20, %v339_v19  ;;  %vm347_vm0 = vweird.f32 %v579_v20 }
 0x156   : > { %vm348_vm2 = vmor %vm346_vm1, %vm347_vm0 }
 0x157   : > { %v342_v22 = vmul.f32 %v579_v20, %v341_v21 }
 0x159   : > { %v343_v23 = vmul.f32 0.5, %v342_v22 }
 0x15b   : > { %v344_v24 = vsub.f32 1.5, %v343_v23 }
 0x15d   : > { %v345_v25 = vmul.f32 %v579_v20, %v344_v24 }
 0x15f   : > { %v349_v26 = vsel %vm348_vm2, %v579_v20, %v345_v25 }
 0x160   : > { %v350_v27 = vmul.f32 %v349_v26, %v335_v16 }
 0x162   : > { %351 = vst [vmem:[#allocation8] sm:$0xff] %v350_v27 }
 0x163 PF: > { %p523_p1 = scmp.eq.s32.totalorder %s449_s18, 1  ;;  %s362_s11 = sshll.u32 %s872_s3, 4  ;;  %s363_s11 = int_to_ptr.hbm [resolvable:$true] %s362_s11 }
 0x164   : > { %s731_s12 = smov [#allocation8]  }
 0x165   : > { %s360_s20 = sshll.u32 %s731_s12, 4  ;;  %s361_s20 = int_to_ptr.vmem [resolvable:$true] %s360_s20 }
 0x166   : > { %512 = dma.vmem_to_hbm [thread:$0]  (%p523_p1), %s361_s20, 128, %s363_s11, [#allocation5]  }
 0x167   : > { %701 = dma.done.wait (%p523_p1), [#allocation5], 128  }
 0x168   : > { %703 = vsyncadd (%p523_p1), [#allocation5], 4294967168 }
 0x169 PF: > { %s20_s17 = sadd.s32 1, %s726_s17   ;;  %s876_s12 = smov %s710_s13 }
 0x16a   : > { %p17_p2 = scmp.ge.s32.totalorder %s20_s17, 4   ;;  %s877_s13 = smov %s714_s14 }
 0x16b   : > { %s878_s14 = smov %s803_s24  ;;  %s879_s15 = smov %s722_s16 }
 0x16c   : > { %s880_s16 = smov %s882_s19  ;;  %19 = sbr.rel (!%p17_p2) target bundleno = 7 (0x7), region = 91 }
 0x171   :  { %376 = vsyncpa [#allocation4], 1 }
 0x172   :  { %378 = vsyncpa [#allocation4 + $0x1], 1 }
 0x173   :  { %379 = vsyncpa [#allocation7], 1 }
 0x174   :  { %381 = vsyncpa [#allocation7 + $0x1], 1 }
 0x175   :  { %382 = vsyncpa [#allocation5], 1 }
 0x176   :  { %384 = vsyncpa [#allocation5 + $0x1], 1 }

</bundles_post_ra>
